<compile_context>
chip_gen: v6e
topology: v6e:2x2x1
jax: 0.10.0
libtpu: 0.0.40
codegen_flags: <defaults>
</compile_context>

<pallas_src>
from typing import NamedTuple

import jax
import jax.numpy as jnp
from jax.experimental import pallas as pl
from jax.experimental.pallas import tpu as pltpu


def _round_up(x: int, m: int) -> int:
    return (x + m - 1) // m * m


class PackedActorBeta(NamedTuple):
    wp: jax.Array          # (w_rows, col)  packed weights (compute dtype)
    bp: jax.Array          # (3, col)       packed biases (f32)
    in_dim: int
    in_pad: int            # 8-aligned input feature width
    hidden: int
    action_dim: int
    h_pad: int              # 128-aligned hidden width
    out_pad: int            # 128-aligned fused-head width
    out_cols: int           # 2 * action_dim (true head width)
    r1: int                 # row offset of fc2 weights
    r2: int                 # row offset of alpha|beta weights


def pack_actor_beta_params(params, *, dtype=jnp.bfloat16) -> PackedActorBeta:
    """Pack Actor_Beta parameters ONCE into two lane-dense slabs.

    params = [(w1,b1), (w2,b2), (w_alpha,b_alpha), (w_beta,b_beta)],
    weights stored as [in_features, out_features], biases as [out_features].
    Do this at init / parameter-update time, NOT per forward call.
    """
    (w1, b1), (w2, b2), (wa, ba), (wb, bb) = params
    in_dim, hidden = w1.shape
    action_dim = wa.shape[1]

    h_pad = _round_up(max(hidden, 128), 128)
    out_cols = 2 * action_dim
    out_pad = _round_up(max(out_cols, 128), 128)
    col = max(h_pad, out_pad)
    in_pad = _round_up(in_dim, 8)        # 8-sublane aligned fc1 row block
    r1 = in_pad                          # fc2 rows start (8-aligned)
    r2 = r1 + h_pad                      # heads rows start (128-aligned)
    w_rows = r2 + h_pad

    wp = jnp.zeros((w_rows, col), dtype)
    wp = wp.at[0:in_dim, 0:hidden].set(w1.astype(dtype))
    wp = wp.at[r1:r1 + hidden, 0:hidden].set(w2.astype(dtype))
    wp = wp.at[r2:r2 + hidden, 0:action_dim].set(wa.astype(dtype))
    wp = wp.at[r2:r2 + hidden, action_dim:out_cols].set(wb.astype(dtype))

    bp = jnp.zeros((3, col), jnp.float32)
    bp = bp.at[0, 0:hidden].set(b1.astype(jnp.float32))
    bp = bp.at[1, 0:hidden].set(b2.astype(jnp.float32))
    bp = bp.at[2, 0:action_dim].set(ba.astype(jnp.float32))
    bp = bp.at[2, action_dim:out_cols].set(bb.astype(jnp.float32))

    return PackedActorBeta(wp, bp, in_dim, in_pad, hidden, action_dim,
                           h_pad, out_pad, out_cols, r1, r2)


def make_actor_beta_kernel(in_pad, h_pad, out_pad, out_cols, r1, r2,
                           use_tanh, compute_dtype):
    """Fused Actor_Beta forward kernel body (static packed-parameter offsets)."""

    def act(v):
        return jnp.tanh(v) if use_tanh else jnp.maximum(v, 0.0)

    def softplus(v):
        # Numerically stable softplus; exp + log1p land on the EUP slot.
        return jnp.maximum(v, 0.0) + jnp.log1p(jnp.exp(-jnp.abs(v)))

    def kernel(x_ref, w_ref, b_ref, o_ref):
        b_all = b_ref[...]                                   # (3, col), f32

        # fc1 + act   (x and W in compute_dtype, f32 accumulation)
        h = jnp.dot(x_ref[...], w_ref[0:in_pad, 0:h_pad],
                    preferred_element_type=jnp.float32)
        h = act(h + b_all[0:1, 0:h_pad]).astype(compute_dtype)

        # fc2 + act
        h = jnp.dot(h, w_ref[r1:r1 + h_pad, 0:h_pad],
                    preferred_element_type=jnp.float32)
        h = act(h + b_all[1:2, 0:h_pad]).astype(compute_dtype)

        # alpha|beta heads fused into one lane-dense (128-wide) matmul
        z = jnp.dot(h, w_ref[r2:r2 + h_pad, 0:out_pad],
                    preferred_element_type=jnp.float32)
        z = z[:, 0:out_cols] + b_all[2:3, 0:out_cols]

        # Narrow (masked) store: 8x fewer HBM writeback bytes than 128-padded.
        o_ref[...] = (softplus(z) + 1.0).astype(o_ref.dtype)

    return kernel


def actor_beta_forward(x, packed: PackedActorBeta, *, use_tanh=False, tb=512):
    """Fused Actor_Beta forward. Returns (alpha, beta), each (batch, action_dim) f32."""
    p = packed
    compute_dtype = p.wp.dtype
    batch = x.shape[0]

    # --- batch tiling: big tiles to amortize grid-step overhead, but keep a
    #     >= 2-iteration grid when batch >= 16 so both v7x TCs get work. ---
    batch8 = _round_up(batch, 8)
    tb = max(8, min(_round_up(tb, 8), batch8))
    if batch8 >= 16:
        tb = min(tb, _round_up(pl.cdiv(batch8, 2), 8))
    b_pad = _round_up(batch8, tb)

    # --- x: cast to compute dtype, zero-pad batch and feature (8-aligned) ---
    xp = x.astype(compute_dtype)
    if b_pad != batch or p.in_pad != p.in_dim:
        xp = jnp.pad(xp, ((0, b_pad - batch), (0, p.in_pad - p.in_dim)))

    kernel = make_actor_beta_kernel(p.in_pad, p.h_pad, p.out_pad, p.out_cols,
                                    p.r1, p.r2, use_tanh, compute_dtype)

    flops = 2 * b_pad * (p.in_pad * p.h_pad + p.h_pad * p.h_pad
                         + p.h_pad * p.out_pad)
    transcendentals = b_pad * p.out_cols * 2            # softplus: exp + log1p
    if use_tanh:
        transcendentals += 2 * b_pad * p.h_pad           # two tanh layers
    bytes_accessed = (xp.size * xp.dtype.itemsize
                      + p.wp.size * p.wp.dtype.itemsize
                      + p.bp.size * p.bp.dtype.itemsize
                      + b_pad * p.out_cols * 4)

    w_rows, col = p.wp.shape
    out = pl.pallas_call(
        kernel,
        out_shape=jax.ShapeDtypeStruct((b_pad, p.out_cols), jnp.float32),
        grid=(b_pad // tb,),
        in_specs=[
            pl.BlockSpec((tb, p.in_pad), lambda i: (i, 0)),   # x tile (pipelined)
            pl.BlockSpec((w_rows, col), lambda i: (0, 0)),    # packed W, resident
            pl.BlockSpec((3, col), lambda i: (0, 0)),         # packed b, resident
        ],
        out_specs=pl.BlockSpec((tb, p.out_cols), lambda i: (i, 0)),
        compiler_params=pltpu.CompilerParams(
            dimension_semantics=("parallel",)),
        cost_estimate=pl.CostEstimate(
            flops=flops,
            transcendentals=transcendentals,
            bytes_accessed=bytes_accessed),
    )(xp, p.wp, p.bp)

    alpha = out[:batch, 0:p.action_dim]
    beta = out[:batch, p.action_dim:p.out_cols]
    return alpha, beta


def init_actor_beta_params(key, in_dim, hidden, action_dim):
    """Deterministic init; weights as [in, out] (transpose of nn.Linear)."""
    def linear(k, fan_in, fan_out):
        kw, kb = jax.random.split(k)
        bound = 1.0 / jnp.sqrt(fan_in)
        w = jax.random.uniform(kw, (fan_in, fan_out), jnp.float32, -bound, bound)
        b = jax.random.uniform(kb, (fan_out,), jnp.float32, -bound, bound)
        return w, b

    k1, k2, k3, k4 = jax.random.split(key, 4)
    return [linear(k1, in_dim, hidden),
            linear(k2, hidden, hidden),
            linear(k3, hidden, action_dim),
            linear(k4, hidden, action_dim)]


def actor_beta_reference(x, params, *, use_tanh=False):
    (w1, b1), (w2, b2), (wa, ba), (wb, bb) = params
    act = jnp.tanh if use_tanh else (lambda v: jnp.maximum(v, 0.0))
    h = act(x @ w1 + b1)
    h = act(h @ w2 + b2)
    alpha = jax.nn.softplus(h @ wa + ba) + 1.0
    beta = jax.nn.softplus(h @ wb + bb) + 1.0
    return alpha, beta


if __name__ == "__main__":
    # Small shapes implied by the module: projection_embed_dim=32,
    # hidden_width=64, action_dim=8, use_tanh=False (ReLU).
    batch, in_dim, hidden, action_dim = 16, 32, 64, 8
    use_tanh = False

    key = jax.random.PRNGKey(0)
    key, kx = jax.random.split(key)
    x = jax.random.normal(kx, (batch, in_dim), jnp.float32)
    params = init_actor_beta_params(key, in_dim, hidden, action_dim)

    ref_alpha, ref_beta = actor_beta_reference(x, params, use_tanh=use_tanh)

    # 1) Exact f32 path (tight tolerance). Packing is done ONCE, outside the call.
    packed_f32 = pack_actor_beta_params(params, dtype=jnp.float32)
    alpha, beta = actor_beta_forward(x, packed_f32, use_tanh=use_tanh, tb=8)
    alpha, beta = jax.block_until_ready((alpha, beta))
    assert alpha.shape == (batch, action_dim)
    assert beta.shape == (batch, action_dim)
    assert jnp.allclose(alpha, ref_alpha, atol=1e-5, rtol=1e-5)
    assert jnp.allclose(beta, ref_beta, atol=1e-5, rtol=1e-5)
    assert bool(jnp.all(alpha > 1.0)) and bool(jnp.all(beta > 1.0))

    # 2) Production bf16 DMA / MXU path (f32 accumulation), default tb (512 ->
    #    clamped to 8 here -> a 2-tile parallel grid), looser tolerance.
    packed_bf16 = pack_actor_beta_params(params)          # bf16 default
    alpha16, beta16 = actor_beta_forward(x, packed_bf16, use_tanh=use_tanh)
    alpha16, beta16 = jax.block_until_ready((alpha16, beta16))
    assert alpha16.shape == (batch, action_dim)
    assert beta16.shape == (batch, action_dim)
    assert jnp.allclose(alpha16, ref_alpha, atol=5e-2, rtol=5e-2)
    assert jnp.allclose(beta16, ref_beta, atol=5e-2, rtol=5e-2)

    print("KERNEL_OK")
</pallas_src>

<mosaic_0001>
module attributes {stable_mosaic.version = 11 : i64} {
  func.func @kernel(%arg0: i32, %arg1: memref<8x32xf32, #tpu.memory_space<vmem>>, %arg2: memref<288x128xf32, #tpu.memory_space<vmem>>, %arg3: memref<3x128xf32, #tpu.memory_space<vmem>>, %arg4: memref<8x16xf32, #tpu.memory_space<vmem>>) attributes {dimension_semantics = [#tpu.dimension_semantics<parallel>], iteration_bounds = array<i64: 2>, scalar_prefetch = 0 : i64, scratch_operands = 0 : i64, tpu.core_type = #tpu.core_type<tc>, window_params = [{transform_indices = @transform_0, window_bounds = array<i64: 8, 32>}, {pipeline_mode = #tpu.pipeline_mode<synchronous>, transform_indices = @transform_1, window_bounds = array<i64: 288, 128>}, {pipeline_mode = #tpu.pipeline_mode<synchronous>, transform_indices = @transform_2, window_bounds = array<i64: 3, 128>}, {transform_indices = @transform_3, window_bounds = array<i64: 8, 16>}]} {
    %c0 = arith.constant 0 : index
    %c0_0 = arith.constant 0 : index
    %0 = vector.load %arg3[%c0, %c0_0] : memref<3x128xf32, #tpu.memory_space<vmem>>, vector<3x128xf32>
    %c0_1 = arith.constant 0 : index
    %c0_2 = arith.constant 0 : index
    %1 = vector.load %arg1[%c0_1, %c0_2] : memref<8x32xf32, #tpu.memory_space<vmem>>, vector<8x32xf32>
    %c0_3 = arith.constant 0 : index
    %c0_4 = arith.constant 0 : index
    %2 = vector.load %arg2[%c0_3, %c0_4] : memref<288x128xf32, #tpu.memory_space<vmem>>, vector<32x128xf32>
    %cst = arith.constant dense<0.000000e+00> : vector<8x128xf32>
    %3 = tpu.matmul %1, %2, %cst {dimension_numbers = #tpu.dot_dimension_numbers<[1], [0], [0], [1], [0, 0, 1, 1], [], []>} : vector<8x32xf32>, vector<32x128xf32>, vector<8x128xf32> -> vector<8x128xf32>
    %4 = vector.extract_strided_slice %0 {offsets = [0, 0], sizes = [1, 128], strides = [1, 1]} : vector<3x128xf32> to vector<1x128xf32>
    %5 = vector.broadcast %4 : vector<1x128xf32> to vector<8x128xf32>
    %6 = arith.addf %3, %5 : vector<8x128xf32>
    %cst_5 = arith.constant 0.000000e+00 : f32
    %7 = vector.broadcast %cst_5 : f32 to vector<8x128xf32>
    %8 = arith.maximumf %6, %7 : vector<8x128xf32>
    %c32 = arith.constant 32 : index
    %c0_6 = arith.constant 0 : index
    %9 = vector.load %arg2[%c32, %c0_6] : memref<288x128xf32, #tpu.memory_space<vmem>>, vector<128x128xf32>
    %cst_7 = arith.constant dense<0.000000e+00> : vector<8x128xf32>
    %10 = tpu.matmul %8, %9, %cst_7 {dimension_numbers = #tpu.dot_dimension_numbers<[1], [0], [0], [1], [0, 0, 1, 1], [], []>} : vector<8x128xf32>, vector<128x128xf32>, vector<8x128xf32> -> vector<8x128xf32>
    %11 = vector.extract_strided_slice %0 {offsets = [1, 0], sizes = [1, 128], strides = [1, 1]} : vector<3x128xf32> to vector<1x128xf32>
    %12 = vector.broadcast %11 : vector<1x128xf32> to vector<8x128xf32>
    %13 = arith.addf %10, %12 : vector<8x128xf32>
    %cst_8 = arith.constant 0.000000e+00 : f32
    %14 = vector.broadcast %cst_8 : f32 to vector<8x128xf32>
    %15 = arith.maximumf %13, %14 : vector<8x128xf32>
    %c160 = arith.constant 160 : index
    %c0_9 = arith.constant 0 : index
    %16 = vector.load %arg2[%c160, %c0_9] : memref<288x128xf32, #tpu.memory_space<vmem>>, vector<128x128xf32>
    %cst_10 = arith.constant dense<0.000000e+00> : vector<8x128xf32>
    %17 = tpu.matmul %15, %16, %cst_10 {dimension_numbers = #tpu.dot_dimension_numbers<[1], [0], [0], [1], [0, 0, 1, 1], [], []>} : vector<8x128xf32>, vector<128x128xf32>, vector<8x128xf32> -> vector<8x128xf32>
    %18 = vector.extract_strided_slice %17 {offsets = [0, 0], sizes = [8, 16], strides = [1, 1]} : vector<8x128xf32> to vector<8x16xf32>
    %19 = vector.extract_strided_slice %0 {offsets = [2, 0], sizes = [1, 16], strides = [1, 1]} : vector<3x128xf32> to vector<1x16xf32>
    %20 = vector.broadcast %19 : vector<1x16xf32> to vector<8x16xf32>
    %21 = arith.addf %18, %20 : vector<8x16xf32>
    %cst_11 = arith.constant 0.000000e+00 : f32
    %22 = vector.broadcast %cst_11 : f32 to vector<8x16xf32>
    %23 = arith.maximumf %21, %22 : vector<8x16xf32>
    %24 = math.absf %21 : vector<8x16xf32>
    %cst_12 = arith.constant 0.000000e+00 : f32
    %25 = vector.broadcast %cst_12 : f32 to vector<8x16xf32>
    %26 = arith.subf %25, %24 : vector<8x16xf32>
    %27 = math.exp %26 : vector<8x16xf32>
    %28 = math.log1p %27 : vector<8x16xf32>
    %29 = arith.addf %23, %28 : vector<8x16xf32>
    %cst_13 = arith.constant 1.000000e+00 : f32
    %30 = vector.broadcast %cst_13 : f32 to vector<8x16xf32>
    %31 = arith.addf %29, %30 : vector<8x16xf32>
    %c0_14 = arith.constant 0 : index
    %c0_15 = arith.constant 0 : index
    %32 = vector.load %arg4[%c0_14, %c0_15] : memref<8x16xf32, #tpu.memory_space<vmem>>, vector<8x16xf32>
    tpu.vector_store %arg4[%c0_14, %c0_15], %31 {strides = array<i32>} : memref<8x16xf32, #tpu.memory_space<vmem>>, vector<8x16xf32>,
    return
  }
  func.func @transform_0(%arg0: i32) -> (i32, i32) {
    %c0_i32 = arith.constant 0 : i32
    %c0_i32_0 = arith.constant 0 : i32
    return %arg0, %c0_i32 : i32, i32
  }
  func.func @transform_1(%arg0: i32) -> (i32, i32) {
    %c0_i32 = arith.constant 0 : i32
    %c0_i32_0 = arith.constant 0 : i32
    %c0_i32_1 = arith.constant 0 : i32
    return %c0_i32, %c0_i32_0 : i32, i32
  }
  func.func @transform_2(%arg0: i32) -> (i32, i32) {
    %c0_i32 = arith.constant 0 : i32
    %c0_i32_0 = arith.constant 0 : i32
    %c0_i32_1 = arith.constant 0 : i32
    return %c0_i32, %c0_i32_0 : i32, i32
  }
  func.func @transform_3(%arg0: i32) -> (i32, i32) {
    %c0_i32 = arith.constant 0 : i32
    %c0_i32_0 = arith.constant 0 : i32
    return %arg0, %c0_i32 : i32, i32
  }
}

</mosaic_0001>

<bundles_post_ra>
// kernel: tpu_custom_call.1
= control target key start
LH: loop header
LB: loop body
LE: loop exit
PB: predicated region body
PF: predicated region fallthrough
CT: control target
= control target key end

     0   :  { %8 = vsyncpa [#allocation3], 0  ;;  %s1202_s0 = inlined_call_operand.hbm [shape: f32[16,32], index: 0, kind: input, shape index: {}]   ;;  %s1203_s1 = inlined_call_operand.hbm [shape: f32[288,128], index: 1, kind: input, shape index: {}]   ;;  %s1204_s2 = inlined_call_operand.hbm [shape: f32[3,128], index: 2, kind: input, shape index: {}]   ;;  %s1205_s3 = inlined_call_operand.hbm [shape: f32[16,16], index: 3, kind: output, shape index: {}]  }
   0x1   :  { %10 = vsyncpa [#allocation3 + $0x1], 0 }
   0x2   :  { %11 = vsyncpa [#allocation6], 0 }
   0x3   :  { %12 = vsyncpa [#allocation4], 0 }
   0x4   :  { %14 = vsyncpa [#allocation4 + $0x1], 0  ;;  %s991_s12 = smov 0   ;;  %s993_s13 = smov 0  }
   0x5   :  { %s995_s14 = smov 0   ;;  %s997_s15 = smov 0  }
   0x6 LB: > { %s1012_s16 = sadd.s32 4294967295, %s961_s15   ;;  %s601_s17 = sadd.s32 4294967294, %s961_s15   ;;  %s961_s15 = sphi %s997_s15, %s1227_s15   ;;  %s957_s14 = sphi %s995_s14, %s1226_s14   ;;  %s953_s13 = sphi %s993_s13, %s1225_s13   ;;  %s949_s12 = sphi %s991_s12, %s1224_s12  }
   0x7   : > { %p40_p0 = scmp.ne.s32.totalorder %s953_s13, %s949_s12  ;;  %p1206_p1 = scmp.eq.s32.totalorder %s1012_s16, 0 }
   0x8   : > { %p112_p3 = scmp.eq.s32.totalorder %s601_s17, 1  ;;  %p602_p5 = scmp.ge.s32.totalorder %s961_s15, 1 }
   0x9   : > { %p1021_p4 = por %p1206_p1, %p40_p0  ;;  %p119_p7 = scmp.lt.s32.totalorder %s961_s15, 3 }
   0xa   : > { %p1026_p6 = por %p112_p3, %p40_p0  ;;  %s963_s21 = smov [#allocation5]  }
   0xb   : > { %s1210_s18 = scalar_select %p1021_p4, 1, 0 }
   0xc   : > { %s1211_s19 = scalar_select %p1026_p6, 1, 0 }
   0xd   : > { %p1031_p8 = pnand %p602_p5, %p119_p7  ;;  %s131_s22 = sshll.u32 %s963_s21, 4  ;;  %s132_s22 = int_to_ptr.vmem [resolvable:$true] %s131_s22 }
   0xe   : > { %s964_s24 = smov [#allocation7]   ;;  %s824_s26 = scalar_lea.vmem %s132_s22, 4608 }
   0xf   : > { %s1212_s20 = scalar_select %p1031_p8, 1, 0 }
  0x10   : > { %p750_p9 = pneg %p1031_p8  ;;  %s145_s25 = sshll.u32 %s964_s24, 4  ;;  %s146_s25 = int_to_ptr.vmem [resolvable:$true] %s145_s25 }
  0x11   : > { %p825_p13 = scmp.ne.s32.totalorder %s132_s22, %s824_s26  ;;  %p832_p5 = scmp.lt.s32.totalorder %s132_s22, %s132_s22 }
  0x12   : > { %p1040_p11 = pnand %p750_p9, %p1206_p1  ;;  %p833_p7 = scmp.lt.s32.totalorder %s824_s26, %s824_s26 }
  0x14   : > { %p815_p12 = pneg %p1040_p11  ;;  %p834_p10 = por %p833_p7, %p832_p5 }
  0x16   : > { %p827_p0 = pnand %p825_p13, %p815_p12 }
  0x18   : > { %p828_p3 = pneg %p827_p0 }
  0x1a   : > { %p835_p9 = pnand %p834_p10, %p828_p3 }
  0x1c   : > { %838 = shalt.err (!%p835_p9)
}
  0x1d   : > { %s965_s27 = smov 128   ;;  %s966_s28 = smov 8  }
  0x1e   : > { %753 = dma.hbm_to_vmem [thread:$0]  (!%p1040_p11), %s1203_s1, 4608, %s132_s22, [#allocation6], %s965_s27, %s965_s27, %s966_s28  }
  0x1f   : > { %s850_s4 = scalar_lea.vmem %s146_s25, 64  ;;  %p858_p2 = scmp.lt.s32.totalorder %s146_s25, %s146_s25 }
  0x20   : > { %p851_p1 = scmp.ne.s32.totalorder %s146_s25, %s850_s4  ;;  %p859_p6 = scmp.lt.s32.totalorder %s850_s4, %s850_s4 }
  0x22   : > { %p853_p13 = pnand %p851_p1, %p815_p12  ;;  %p860_p5 = por %p859_p6, %p858_p2 }
  0x24   : > { %p854_p0 = pneg %p853_p13 }
  0x26   : > { %p861_p10 = pnand %p860_p5, %p854_p0 }
  0x28   : > { %864 = shalt.err (!%p861_p10)
}
  0x29   : > { %756 = dma.hbm_to_vmem [thread:$0]  (!%p1040_p11), %s1204_s2, 64, %s146_s25, [#allocation6]  }
  0x2a   : > { %s1063_s7 = sadd.s32 1, %s961_s15   ;;  %s27_s8 = sadd.s32 1, %s957_s14 }
  0x2b   : > { %s24_s9 = ssub.s32 %s961_s15, %s1063_s7  ;;  %p34_p1 = scmp.ne.s32.totalorder %s957_s14, %s953_s13 }
  0x2c   : > { %p25_p2 = scmp.eq.s32.totalorder %s24_s9, 0  ;;  %p35_p6 = scmp.eq.s32.totalorder %s961_s15, 0 }
  0x2d   : > { %p1214_p12 = scmp.eq.s32.totalorder %s1012_s16, 1  ;;  %p767_p7 = scmp.lt.s32.totalorder %s961_s15, 2 }
  0x2e   : > { %s1079_s11 = scalar_select %p25_p2, %s957_s14, %s27_s8  }
  0x2f   : > { %p1073_p3 = por %p1214_p12, %p34_p1  ;;  %p36_p9 = por %p35_p6, %p34_p1 }
  0x30   : > { %s156_s17 = sand.u32 1, %s957_s14   ;;  %s607_s22 = sshll.u32 %s961_s15, 7 }
  0x31   : > { %s1215_s10 = scalar_select %p1073_p3, 1, 0 }
  0x32   : > { %s606_s21 = sshll.u32 %s156_s17, 3  ;;  %s1086_s25 = scalar_lea.hbm %s1202_s0, %s607_s22 }
  0x33   : > { %s160_s26 = scalar_lea.vmem [#allocation2], %s606_s21  ;;  %p1088_p11 = pnand %p767_p7, %p36_p9 }
  0x34   : > { %s167_s27 = sshll.u32 %s160_s26, 4  ;;  %s157_s29 = scalar_lea.sflag [#allocation3], %s156_s17  ;;  %s168_s27 = int_to_ptr.vmem [resolvable:$true] %s167_s27 }
  0x35   : > { %s865_s30 = scalar_lea.hbm %s1086_s25, 128  ;;  %p867_p0 = pneg %p1088_p11 }
  0x36   : > { %p866_p13 = scmp.ne.s32.totalorder %s1086_s25, %s865_s30  ;;  %s870_s6 = scalar_lea.hbm %s1202_s0, 256 }
  0x37   : > { %p871_p1 = scmp.lt.s32.totalorder %s1086_s25, %s1202_s0  ;;  %p872_p2 = scmp.lt.s32.totalorder %s870_s6, %s865_s30 }
  0x38   : > { %p868_p5 = pnand %p867_p0, %p866_p13 }
  0x39   : > { %p873_p6 = por %p872_p2, %p871_p1 }
  0x3a   : > { %p869_p10 = pneg %p868_p5 }
  0x3c   : > { %p874_p12 = pnand %p873_p6, %p869_p10 }
  0x3e   : > { %877 = shalt.err (!%p874_p12)
}
  0x3f   : > { %s878_s21 = scalar_lea.vmem %s168_s27, 128  ;;  %s967_s17 = smov [#allocation2]  }
  0x40   : > { %p879_p7 = scmp.ne.s32.totalorder %s168_s27, %s878_s21  ;;  %s883_s22 = sshll.u32 %s967_s17, 4  ;;  %s884_s22 = int_to_ptr.vmem [resolvable:$false] %s883_s22 }
  0x41   : > { %s885_s23 = scalar_lea.vmem %s884_s22, 256  ;;  %p886_p13 = scmp.lt.s32.totalorder %s168_s27, %s884_s22 }
  0x42   : > { %p881_p9 = pnand %p879_p7, %p867_p0  ;;  %p887_p5 = scmp.lt.s32.totalorder %s885_s23, %s878_s21 }
  0x44   : > { %p882_p3 = pneg %p881_p9  ;;  %p888_p4 = por %p887_p5, %p886_p13 }
  0x46   : > { %p889_p8 = pnand %p888_p4, %p882_p3 }
  0x48   : > { %892 = shalt.err (!%p889_p8)
}
  0x49   : > { %760 = dma.hbm_to_vmem [thread:$0]  (!%p1088_p11), %s1086_s25, 128, %s168_s27, %s157_s29  }
  0x4a   : > { %p1217_p10 = scmp.ne.s32.totalorder %s1212_s20, 0 }
  0x4b   : > { %s1109_s24 = sand.u32 (!%p1217_p10), 1, %s953_s13   ;;  %p1218_p4 = scmp.ne.s32.totalorder (!%p1217_p10), %s1210_s18, 0 }
  0x4c   : > { %176 = sbr.rel (%p1217_p10) target bundleno = 740 (0x2e4), region = 32  ;;  %s609_s26 = sshll.u32 (!%p1217_p10), %s1109_s24, 3 }
  0x4d   : > { %s179_s30 = scalar_lea.sflag (!%p1217_p10), [#allocation3], %s1109_s24  ;;  %s182_s4 = scalar_lea.vmem (!%p1217_p10), [#allocation2], %s609_s26 }
  0x51   : > { %936 = dma.done.wait (%p1218_p4), %s179_s30, 128  }
  0x52   : > { %938 = vsyncadd (%p1218_p4), %s179_s30, 4294967168  ;;  %p1219_p8 = scmp.eq.s32.totalorder %s1012_s16, 0 }
  0x54   : > { %940 = dma.done.wait (%p1219_p8), [#allocation6], 4672   ;;  %p1220_p3 = pmov %p1219_p8 }
  0x55   : > { %v968_v0 = vmov 0.0   ;;  %vm969_vm0 = vmmov 0   ;;  %v218_v1 = vld [vmem:[#allocation5 + $0x18] sm:$0xff]  ;;  %v217_v2 = vld [vmem:[#allocation5 + $0x10] sm:$0xff]  ;;  %v216_v4 = vld [vmem:[#allocation5 + $0x8] sm:$0xff]  ;;  %vm223_vm1 = vcmask 261120   ;;  %v219_v35 = vlaneseq }
  0x56   : > { %942 = vsyncadd (%p1220_p3), [#allocation6], 4294962624  ;;  %657 = vmatprep.subr.mxu0 %v968_v0  ;;  %665 = vmatprep.mubr.msk.f32.mxu0 %vm969_vm0, %v968_v0  ;;  %v313_v3 = vld [vmem:[#allocation5 + $0x98] sm:$0xff]  ;;  %v312_v5 = vld [vmem:[#allocation5 + $0x90] sm:$0xff]  ;;  %s615_s18 = sshll.u32 %s1012_s16, 7  ;;  %s212_s20 = scalar_lea.vmem [#allocation8], %s609_s26 }
  0x57   : > { %668 = vmatprep.subr.mxu1 %v968_v0  ;;  %700 = vmatprep.mubr.msk.f32.mxu1 %vm969_vm0, %v968_v0  ;;  %v311_v6 = vld [vmem:[#allocation5 + $0x88] sm:$0xff]  ;;  %v215_v7 = vld [vmem:[#allocation5] sm:$0xff]  ;;  %v214_v8 = vld [vmem:[%s182_s4] sm:$0xff]  ;;  %v220_v36 = vshrl.u32 %v219_v35, 7  ;;  %s512_s25 = sshll.u32 %s212_s20, 4  ;;  %vm496_vm3 = vcmask 130048   ;;  %s510_s29 = scalar_lea.hbm %s1205_s3, %s615_s18  ;;  %s513_s25 = int_to_ptr.vmem [resolvable:$true] %s512_s25 }
  0x58   : > { %658 = vmatpush3.msra.mxu0 %v218_v1  ;;  %669 = vmatpush3.msra.mxu1 %v313_v3  ;;  %v310_v9 = vld [vmem:[#allocation5 + $0x80] sm:$0xff]  ;;  %v309_v10 = vld [vmem:[#allocation5 + $0x78] sm:$0xff]  ;;  %v308_v11 = vld [vmem:[#allocation5 + $0x70] sm:$0xff]  ;;  %s499_s5 = scalar_lea.sflag [#allocation4], %s1109_s24  ;;  %s893_s6 = scalar_lea.vmem %s513_s25, 128 }
  0x59   : > { %659 = vmatprep.subr.mxu0 %v968_v0  ;;  %670 = vmatprep.subr.mxu1 %v968_v0  ;;  %v307_v12 = vld [vmem:[#allocation5 + $0x68] sm:$0xff]  ;;  %v306_v13 = vld [vmem:[#allocation5 + $0x60] sm:$0xff]  ;;  %v305_v14 = vld [vmem:[#allocation5 + $0x58] sm:$0xff]  ;;  %v221_v37 = vsub.s32 0, %v220_v36  ;;  %v316_v47 = vsub.s32 1, %v220_v36  ;;  %v477_v53 = vsub.s32 2, %v220_v36  ;;  %p894_p11 = scmp.ne.s32.totalorder %s513_s25, %s893_s6 }
  0x5a   : > { %660 = vmatpush3.msra.mxu0 %v217_v2  ;;  %671 = vmatpush3.msra.mxu1 %v312_v5  ;;  %v304_v15 = vld [vmem:[#allocation5 + $0x50] sm:$0xff]  ;;  %v303_v16 = vld [vmem:[#allocation5 + $0x48] sm:$0xff]  ;;  %v302_v17 = vld [vmem:[#allocation5 + $0x40] sm:$0xff]  ;;  %p1221_p0 = scmp.ne.s32.totalorder %s1215_s10, 0  ;;  %s970_s8 = smov [#allocation8]  }
  0x5b   : > { %661 = vmatprep.subr.mxu0 %v968_v0  ;;  %672 = vmatprep.subr.mxu1 %v968_v0  ;;  %v301_v18 = vld [vmem:[#allocation5 + $0x38] sm:$0xff]  ;;  %v300_v19 = vld [vmem:[#allocation5 + $0x30] sm:$0xff]  ;;  %v299_v20 = vld [vmem:[#allocation5 + $0x28] sm:$0xff]  ;;  %s897_s16 = sshll.u32 %s970_s8, 4  ;;  %s898_s16 = int_to_ptr.vmem [resolvable:$false] %s897_s16 }
  0x5c   : > { %662 = vmatpush3.msra.mxu0 %v216_v4  ;;  %673 = vmatpush3.msra.mxu1 %v311_v6  ;;  %v298_v21 = vld [vmem:[#allocation5 + $0x20] sm:$0xff]  ;;  %v404_v22 = vld [vmem:[#allocation5 + $0x118] sm:$0xff]  ;;  %v403_v23 = vld [vmem:[#allocation5 + $0x110] sm:$0xff]  ;;  %p895_p1 = pnand %p894_p11, %p1221_p0  ;;  %s899_s9 = scalar_lea.vmem %s898_s16, 256 }
  0x5d   : > { %663 = vmatprep.subr.mxu0 %v968_v0  ;;  %674 = vmatprep.subr.mxu1 %v968_v0  ;;  %v402_v24 = vld [vmem:[#allocation5 + $0x108] sm:$0xff]  ;;  %v401_v25 = vld [vmem:[#allocation5 + $0x100] sm:$0xff]  ;;  %v400_v26 = vld [vmem:[#allocation5 + $0xf8] sm:$0xff]  ;;  %p900_p6 = scmp.lt.s32.totalorder %s513_s25, %s898_s16  ;;  %p901_p12 = scmp.lt.s32.totalorder %s899_s9, %s893_s6 }
  0x5e   : > { %664 = vmatpush3.msra.mxu0 %v215_v7  ;;  %675 = vmatpush3.msra.mxu1 %v310_v9  ;;  %v399_v27 = vld [vmem:[#allocation5 + $0xf0] sm:$0xff]  ;;  %v398_v28 = vld [vmem:[#allocation5 + $0xe8] sm:$0xff]  ;;  %v397_v29 = vld [vmem:[#allocation5 + $0xe0] sm:$0xff]  ;;  %p896_p2 = pneg %p895_p1 }
  0x5f   : > { %666 = vmatmul.mubr.msk.f32.vlgmr.msra.gmra.mxu0 %vm223_vm1, %v214_v8  ;;  %676 = vmatprep.subr.mxu1 %v968_v0  ;;  %v396_v30 = vld [vmem:[#allocation5 + $0xd8] sm:$0xff]  ;;  %v395_v31 = vld [vmem:[#allocation5 + $0xd0] sm:$0xff]  ;;  %v394_v32 = vld [vmem:[#allocation5 + $0xc8] sm:$0xff]  ;;  %p902_p7 = por %p901_p12, %p900_p6 }
  0x60   : > { %703 = vmatprep.subr.mxu0 %v968_v0  ;;  %677 = vmatpush3.msra.mxu1 %v309_v10  ;;  %v393_v33 = vld [vmem:[#allocation5 + $0xc0] sm:$0xff]  ;;  %v392_v34 = vld [vmem:[#allocation5 + $0xb8] sm:$0xff]  ;;  %v391_v44 = vld [vmem:[#allocation5 + $0xb0] sm:$0xff] }
  0x61   : > { %735 = vmatprep.mubr.msk.f32.mxu0 %vm969_vm0, %v968_v0  ;;  %678 = vmatprep.subr.mxu1 %v968_v0  ;;  %v213_v38 = vld [vmem:[#allocation7] sm:$0x7]  ;;  %v390_v45 = vld [vmem:[#allocation5 + $0xa8] sm:$0xff]  ;;  %p903_p9 = pnand %p902_p7, %p896_p2 }
  0x62   : > { %679 = vmatpush3.msra.mxu1 %v308_v11  ;;  %704 = vmatpush3.msra.mxu0 %v404_v22  ;;  %v222_v39 = vrot.slane %v213_v38, %v221_v37  ;;  %v389_v46 = vld [vmem:[#allocation5 + $0xa0] sm:$0xff]  ;;  %v317_v48 = vrot.slane %v213_v38, %v316_v47  ;;  %v478_v54 = vrot.slane %v213_v38, %v477_v53 }
  0x63   : > { %680 = vmatprep.subr.mxu1 %v968_v0  ;;  %705 = vmatprep.subr.mxu0 %v968_v0 }
  0x64   : > { %681 = vmatpush3.msra.mxu1 %v307_v12  ;;  %706 = vmatpush3.msra.mxu0 %v403_v23 }
  0x65   : > { %682 = vmatprep.subr.mxu1 %v968_v0  ;;  %707 = vmatprep.subr.mxu0 %v968_v0 }
  0x66   : > { %683 = vmatpush3.msra.mxu1 %v306_v13  ;;  %708 = vmatpush3.msra.mxu0 %v402_v24 }
  0x67   : > { %684 = vmatprep.subr.mxu1 %v968_v0  ;;  %709 = vmatprep.subr.mxu0 %v968_v0 }
  0x68   : > { %685 = vmatpush3.msra.mxu1 %v305_v14  ;;  %710 = vmatpush3.msra.mxu0 %v401_v25 }
  0x69   : > { %686 = vmatprep.subr.mxu1 %v968_v0  ;;  %711 = vmatprep.subr.mxu0 %v968_v0 }
  0x6a   : > { %687 = vmatpush3.msra.mxu1 %v304_v15  ;;  %712 = vmatpush3.msra.mxu0 %v400_v26 }
  0x6b   : > { %688 = vmatprep.subr.mxu1 %v968_v0  ;;  %713 = vmatprep.subr.mxu0 %v968_v0 }
  0x6c   : > { %689 = vmatpush3.msra.mxu1 %v303_v16  ;;  %714 = vmatpush3.msra.mxu0 %v399_v27 }
  0x6d   : > { %690 = vmatprep.subr.mxu1 %v968_v0  ;;  %715 = vmatprep.subr.mxu0 %v968_v0 }
  0x6e   : > { %691 = vmatpush3.msra.mxu1 %v302_v17  ;;  %716 = vmatpush3.msra.mxu0 %v398_v28 }
  0x6f   : > { %692 = vmatprep.subr.mxu1 %v968_v0  ;;  %717 = vmatprep.subr.mxu0 %v968_v0 }
  0x70   : > { %693 = vmatpush3.msra.mxu1 %v301_v18  ;;  %718 = vmatpush3.msra.mxu0 %v397_v29 }
  0x71   : > { %694 = vmatprep.subr.mxu1 %v968_v0  ;;  %719 = vmatprep.subr.mxu0 %v968_v0 }
  0x72   : > { %695 = vmatpush3.msra.mxu1 %v300_v19  ;;  %720 = vmatpush3.msra.mxu0 %v396_v30 }
  0x73   : > { %696 = vmatprep.subr.mxu1 %v968_v0  ;;  %721 = vmatprep.subr.mxu0 %v968_v0 }
  0x74   : > { %697 = vmatpush3.msra.mxu1 %v299_v20  ;;  %722 = vmatpush3.msra.mxu0 %v395_v31 }
  0x75   : > { %698 = vmatprep.subr.mxu1 %v968_v0  ;;  %723 = vmatprep.subr.mxu0 %v968_v0 }
  0x76   : > { %699 = vmatpush3.msra.mxu1 %v298_v21  ;;  %724 = vmatpush3.msra.mxu0 %v394_v32 }
  0x77   : > { %725 = vmatprep.subr.mxu0 %v968_v0 }
  0x78   : > { %726 = vmatpush3.msra.mxu0 %v393_v33 }
  0x79   : > { %727 = vmatprep.subr.mxu0 %v968_v0 }
  0x7a   : > { %728 = vmatpush3.msra.mxu0 %v392_v34 }
  0x7b   : > { %729 = vmatprep.subr.mxu0 %v968_v0 }
  0x7c   : > { %730 = vmatpush3.msra.mxu0 %v391_v44 }
  0x7d   : > { %731 = vmatprep.subr.mxu0 %v968_v0 }
  0x7e   : > { %732 = vmatpush3.msra.mxu0 %v390_v45 }
  0x7f   : > { %733 = vmatprep.subr.mxu0 %v968_v0 }
  0x80   : > { %734 = vmatpush3.msra.mxu0 %v389_v46 }
 0x11f   : > { %v293_v40 = vpop.f32.mrf.mxu0 }
 0x120   : > { %v294_v41 = vadd.f32 %v293_v40, %v222_v39 }
 0x121   : > { %v667_v42 = vpop.f32.mrf.mxu0 }
 0x122   : > { %v297_v43 = vmax.f32 %v294_v41, 0.0 }
 0x124   : > { %701 = vmatmul.mubr.f32.vlgmr.msra.gmra.mxu1 %v297_v43 }
 0x1e4   : > { %v384_v49 = vpop.f32.mrf.mxu1 }
 0x1e5   : > { %v385_v50 = vadd.f32 %v384_v49, %v317_v48 }
 0x1e6   : > { %v702_v51 = vpop.f32.mrf.mxu1 }
 0x1e7   : > { %v388_v52 = vmax.f32 %v385_v50, 0.0 }
 0x1e9   : > { %736 = vmatmul.mubr.f32.vlgmr.msra.gmra.mxu0 %v388_v52 }
 0x2a9   : > { %v471_v55 = vpop.f32.mrf.mxu0 }
 0x2aa   : > { %v479_v56 = vadd.f32 %v478_v54, %v471_v55 }
 0x2ab   : > { %v737_v57 = vpop.f32.mrf.mxu0 }
 0x2ac   : > { %v481_v58 = vand.u32 2147483647, %v479_v56  ;;  %v480_v5 = vmax.f32 %v479_v56, 0.0 }
 0x2ae   : > { %v482_v59 = vsub.f32 0.0, %v481_v58 }
 0x2b0   : > { %v483_v60 = vmul.f32 1.442695, %v482_v59 }
 0x2b2   : > { %809 = vpow2.f32 %v483_v60 }
 0x2bf   : > { %v810_v61 = vpop.eup %809 }
 0x2c0   : > { %v485_v62 = vadd.f32 1.0, %v810_v61  ;;  %v488_v63 = vmul.f32 -0.5, %v810_v61  ;;  %v491_v1 = vand.u32 2147483647, %v810_v61 }
 0x2c2   : > { %811 = vlog2.f32 %v485_v62  ;;  %v489_v0 = vadd.f32 1.0, %v488_v63  ;;  %vm492_vm2 = vcmp.lt.f32.partialorder %v491_v1, 0.0004427343 }
 0x2c4   : > { %v490_v4 = vmul.f32 %v810_v61, %v489_v0 }
 0x2cf   : > { %v812_v2 = vpop.eup %811 }
 0x2d0   : > { %v487_v3 = vmul.f32 0.6931472, %v812_v2 }
 0x2d2   : > { %v493_v6 = vsel %vm492_vm2, %v490_v4, %v487_v3 }
 0x2d3   : > { %v494_v7 = vadd.f32 %v493_v6, %v480_v5 }
 0x2d5   : > { %v495_v8 = vadd.f32 1.0, %v494_v7 }
 0x2d7   : > { %497 = vst.msk [vmem:[%s212_s20] sm:$0xff] %vm496_vm3, %v495_v8 }
 0x2d8   : > { %906 = shalt.err (!%p903_p9)
}
 0x2d9   : > { %s907_s21 = scalar_lea.hbm %s510_s29, 128  ;;  %s911_s23 = scalar_lea.hbm %s1205_s3, 256 }
 0x2da   : > { %p908_p13 = scmp.ne.s32.totalorder %s510_s29, %s907_s21  ;;  %p912_p4 = scmp.lt.s32.totalorder %s510_s29, %s1205_s3 }
 0x2db   : > { %p913_p8 = scmp.lt.s32.totalorder %s911_s23, %s907_s21 }
 0x2dc   : > { %p909_p5 = pnand %p908_p13, %p1221_p0 }
 0x2dd   : > { %p914_p3 = por %p913_p8, %p912_p4 }
 0x2de   : > { %p910_p10 = pneg %p909_p5 }
 0x2e0   : > { %p915_p11 = pnand %p914_p3, %p910_p10 }
 0x2e2   : > { %918 = shalt.err (!%p915_p11)
}
 0x2e3   : > { %748 = dma.vmem_to_hbm [thread:$0]  (%p1221_p0), %s513_s25, 128, %s510_s29, %s499_s5  }
 0x2e4 PF: > { %s524_s30 = sand.u32 1, %s949_s12   ;;  %p1222_p1 = scmp.ne.s32.totalorder %s1211_s19, 0 }
 0x2e5   : > { %p1223_p2 = scmp.ge.s32.totalorder %s961_s15, 2  ;;  %s525_s4 = scalar_lea.sflag [#allocation4], %s524_s30 }
 0x2e7   : > { %p762_p6 = pnand %p1223_p2, %p1222_p1 }
 0x2e9   : > { %p763_p12 = pneg %p762_p6 }
 0x2eb   : > { %944 = dma.done.wait (%p763_p12), %s525_s4, 128  }
 0x2ec   : > { %946 = vsyncadd (%p763_p12), %s525_s4, 4294967168  ;;  %p17_p7 = scmp.ge.s32.totalorder %s1063_s7, 4   ;;  %s1224_s12 = smov %s953_s13 }
 0x2ed   : > { %s1225_s13 = smov %s957_s14  ;;  %s1226_s14 = smov %s1079_s11 }
 0x2ee   : > { %s1227_s15 = smov %s1063_s7  ;;  %19 = sbr.rel (!%p17_p7) target bundleno = 6 (0x6), region = 85 }
 0x2f3   :  { %530 = vsyncpa [#allocation3], 1 }
 0x2f4   :  { %532 = vsyncpa [#allocation3 + $0x1], 1 }
 0x2f5   :  { %533 = vsyncpa [#allocation6], 1 }
 0x2f6   :  { %534 = vsyncpa [#allocation4], 1 }
 0x2f7   :  { %536 = vsyncpa [#allocation4 + $0x1], 1 }

</bundles_post_ra>
